<compile_context>
chip_gen: v7x
topology: tpu7x:2x2x1
jax: 0.10.0
libtpu: 0.0.40
codegen_flags: <defaults>
</compile_context>

<pallas_src>
import jax
import jax.numpy as jnp
from jax.experimental import pallas as pl
from jax.experimental.pallas import tpu as pltpu

C_IN, C_MID, C_OUT = 3, 5, 3  # fixed by the PyTorch module


def fused_kernel(wa_ref, wb_ref, bc_ref, x_ref, o_ref, sh_ref):
    """x_ref : (Nb, C_IN, H, W)      raw input block (VMEM)
       o_ref : (Nb, C_OUT, H+1, W)   output block (VMEM)
       sh_ref: (Nb, 8 + H, W)        f32 scratch used for the 1-row shift
       wa_ref/wb_ref : (C_IN*C_OUT,) folded weights (SMEM)
       bc_ref        : (C_OUT,)      folded bias    (SMEM)
    """
    Nb, _, H, W = x_ref.shape

    # Load each input channel plane once (aligned, whole-plane reads).
    xc = [x_ref[:, c, :, :] for c in range(C_IN)]

    # Rows 0..7 of the shift scratch stay zero; row 7 supplies the zero that
    # feeds output row 0 (the "x[h-1]" tap does not exist there).
    sh_ref[:, 0:8, :] = jnp.zeros((Nb, 8, W), jnp.float32)

    for o in range(C_OUT):
        # s_a[h] = sum_c x[c,h] * Wa[c,o]   (kh=0 tap -> output row h)
        # s_b[h] = sum_c x[c,h] * Wb[c,o]   (kh=1 tap -> output row h+1)
        s_a = xc[0] * wa_ref[o]
        s_b = xc[0] * wb_ref[o]
        for c in range(1, C_IN):
            s_a = s_a + xc[c] * wa_ref[c * C_OUT + o]
            s_b = s_b + xc[c] * wb_ref[c * C_OUT + o]

        # One-row shift through VMEM: aligned store at row 8, load at row 7.
        sh_ref[:, 8:8 + H, :] = s_b
        s_b_shift = sh_ref[:, 7:7 + H, :]     # [h] == s_b[h-1], zero at h==0

        bias = bc_ref[o]
        o_ref[:, o, 0:H, :] = jnp.tanh(s_a + s_b_shift + bias)
        # Last output row (h == H) only sees the kh=1 tap of input row H-1.
        o_ref[:, o, H, :] = jnp.tanh(s_b[:, H - 1, :] + bias)


def model_forward(x, w1, b1, w2, b2):
    """x: (N, 3, H, W) float32.  Returns (N, 3, H+1, W) float32."""
    N, C, H, W = x.shape
    assert C == C_IN
    Hout = H + 1

    # ---- fold the two linear layers (exact linear composition) ----
    w1a = w1[:, :, 0, 0].astype(jnp.float32)            # (C_IN, C_MID)
    w1b = w1[:, :, 1, 0].astype(jnp.float32)            # (C_IN, C_MID)
    w2m = w2[:, :, 0, 0].astype(jnp.float32)            # (C_MID, C_OUT)
    wa = (w1a @ w2m).reshape(-1)                        # (C_IN*C_OUT,)
    wb = (w1b @ w2m).reshape(-1)                        # (C_IN*C_OUT,)
    bc = b1.astype(jnp.float32) @ w2m + b2.astype(jnp.float32)   # (C_OUT,)

    x = x.astype(jnp.float32)

    # ---- batch images per grid step: target a few MiB of HBM payload ----
    bytes_per_image = (C_IN * H + C_OUT * Hout) * W * 4          # in + out
    target_bytes = 4 * 1024 * 1024
    nb = max(1, min(N, target_bytes // max(bytes_per_image, 1)))
    if N >= 2:                        # keep >= 2 grid steps (v7x megacore)
        nb = min(nb, max(1, N // 2))
    while N % nb:                     # keep every block exactly in-bounds
        nb -= 1
    grid = (N // nb,)

    smem_spec = pl.BlockSpec(memory_space=pltpu.MemorySpace.SMEM)
    in_spec = pl.BlockSpec((nb, C_IN, H, W), lambda n: (n, 0, 0, 0))
    out_spec = pl.BlockSpec((nb, C_OUT, Hout, W), lambda n: (n, 0, 0, 0))

    return pl.pallas_call(
        fused_kernel,
        out_shape=jax.ShapeDtypeStruct((N, C_OUT, Hout, W), jnp.float32),
        grid_spec=pltpu.PrefetchScalarGridSpec(
            num_scalar_prefetch=0,
            grid=grid,
            # 84 B of folded params live in SMEM with a constant block index,
            # so they are delivered once for the whole grid.
            in_specs=[smem_spec, smem_spec, smem_spec, in_spec],
            out_specs=out_spec,
            scratch_shapes=[pltpu.VMEM((nb, 8 + H, W), jnp.float32)],
        ),
        compiler_params=pltpu.CompilerParams(
            dimension_semantics=("parallel",),
            vmem_limit_bytes=32 * 1024 * 1024,
        ),
    )(wa, wb, bc, x)


def reference_forward(x, w1, b1, w2, b2):
    """Pure-JAX reference (same math as torch ConvTranspose2d, unfolded)."""
    N, C, H, W = x.shape
    zero_row = jnp.zeros((N, C, 1, W), x.dtype)
    a = jnp.concatenate([x, zero_row], axis=2)     # x[h]   (zero at h == H)
    b = jnp.concatenate([zero_row, x], axis=2)     # x[h-1] (zero at h == 0)
    v1 = (jnp.einsum('nchw,cm->nmhw', a, w1[:, :, 0, 0])
          + jnp.einsum('nchw,cm->nmhw', b, w1[:, :, 1, 0])
          + b1[None, :, None, None])
    v2 = jnp.einsum('nmhw,mo->nohw', v1, w2[:, :, 0, 0]) + b2[None, :, None, None]
    return jnp.tanh(v2)


if __name__ == "__main__":
    key = jax.random.PRNGKey(0)
    kx, k1, k2, k3, k4 = jax.random.split(key, 5)

    # Small input consistent with the module (3 input channels); N > 1 so the
    # batched-block grid path (grid=(2,), Nb=4) is exercised.
    N, H, W = 8, 16, 128
    x = jax.random.normal(kx, (N, C_IN, H, W), jnp.float32)

    # Deterministic parameter init (shapes match nn.ConvTranspose2d defaults).
    w1 = jax.random.normal(k1, (C_IN, C_MID, 2, 1), jnp.float32) * 0.3
    b1 = jax.random.normal(k2, (C_MID,), jnp.float32) * 0.1
    w2 = jax.random.normal(k3, (C_MID, C_OUT, 1, 1), jnp.float32) * 0.3
    b2 = jax.random.normal(k4, (C_OUT,), jnp.float32) * 0.1

    out = model_forward(x, w1, b1, w2, b2)
    jax.block_until_ready(out)

    ref = reference_forward(x, w1, b1, w2, b2)
    assert out.shape == (N, C_OUT, H + 1, W), out.shape
    assert jnp.allclose(out, ref, atol=1e-5, rtol=1e-5), "mismatch vs reference"

    print("KERNEL_OK")
</pallas_src>

<mosaic_0001>
module attributes {stable_mosaic.version = 11 : i64} {
  func.func @fused_kernel(%arg0: i32, %arg1: memref<9xf32, #tpu.memory_space<smem>>, %arg2: memref<9xf32, #tpu.memory_space<smem>>, %arg3: memref<3xf32, #tpu.memory_space<smem>>, %arg4: memref<4x3x16x128xf32, #tpu.memory_space<vmem>>, %arg5: memref<4x3x17x128xf32, #tpu.memory_space<vmem>>, %arg6: memref<4x24x128xf32, #tpu.memory_space<vmem>>) attributes {dimension_semantics = [#tpu.dimension_semantics<parallel>], iteration_bounds = array<i64: 2>, scalar_prefetch = 0 : i64, scratch_operands = 1 : i64, tpu.core_type = #tpu.core_type<tc>, window_params = [{transform_indices = @transform_0, window_bounds = array<i64: 9>}, {transform_indices = @transform_1, window_bounds = array<i64: 9>}, {transform_indices = @transform_2, window_bounds = array<i64: 3>}, {transform_indices = @transform_3, window_bounds = array<i64: 4, 3, 16, 128>}, {transform_indices = @transform_4, window_bounds = array<i64: 4, 3, 17, 128>}]} {
    %c0 = arith.constant 0 : index
    %c0_0 = arith.constant 0 : index
    %c0_1 = arith.constant 0 : index
    %c0_2 = arith.constant 0 : index
    %0 = vector.load %arg4[%c0, %c0_0, %c0_1, %c0_2] : memref<4x3x16x128xf32, #tpu.memory_space<vmem>>, vector<4x1x16x128xf32>
    %1 = vector.shape_cast %0 : vector<4x1x16x128xf32> to vector<4x16x128xf32>
    %c0_3 = arith.constant 0 : index
    %c1 = arith.constant 1 : index
    %c0_4 = arith.constant 0 : index
    %c0_5 = arith.constant 0 : index
    %2 = vector.load %arg4[%c0_3, %c1, %c0_4, %c0_5] : memref<4x3x16x128xf32, #tpu.memory_space<vmem>>, vector<4x1x16x128xf32>
    %3 = vector.shape_cast %2 : vector<4x1x16x128xf32> to vector<4x16x128xf32>
    %c0_6 = arith.constant 0 : index
    %c2 = arith.constant 2 : index
    %c0_7 = arith.constant 0 : index
    %c0_8 = arith.constant 0 : index
    %4 = vector.load %arg4[%c0_6, %c2, %c0_7, %c0_8] : memref<4x3x16x128xf32, #tpu.memory_space<vmem>>, vector<4x1x16x128xf32>
    %5 = vector.shape_cast %4 : vector<4x1x16x128xf32> to vector<4x16x128xf32>
    %cst = arith.constant 0.000000e+00 : f32
    %6 = vector.broadcast %cst : f32 to vector<4x8x128xf32>
    %c0_9 = arith.constant 0 : index
    %c0_10 = arith.constant 0 : index
    %c0_11 = arith.constant 0 : index
    %7 = vector.load %arg6[%c0_9, %c0_10, %c0_11] : memref<4x24x128xf32, #tpu.memory_space<vmem>>, vector<4x8x128xf32>
    tpu.vector_store %arg6[%c0_9, %c0_10, %c0_11], %6 {strides = array<i32>} : memref<4x24x128xf32, #tpu.memory_space<vmem>>, vector<4x8x128xf32>,
    %c0_12 = arith.constant 0 : index
    %8 = memref.load %arg1[%c0_12] : memref<9xf32, #tpu.memory_space<smem>>
    %9 = vector.broadcast %8 : f32 to vector<4x16x128xf32>
    %10 = arith.mulf %1, %9 : vector<4x16x128xf32>
    %c0_13 = arith.constant 0 : index
    %11 = memref.load %arg2[%c0_13] : memref<9xf32, #tpu.memory_space<smem>>
    %12 = vector.broadcast %11 : f32 to vector<4x16x128xf32>
    %13 = arith.mulf %1, %12 : vector<4x16x128xf32>
    %c3 = arith.constant 3 : index
    %14 = memref.load %arg1[%c3] : memref<9xf32, #tpu.memory_space<smem>>
    %15 = vector.broadcast %14 : f32 to vector<4x16x128xf32>
    %16 = arith.mulf %3, %15 : vector<4x16x128xf32>
    %17 = arith.addf %10, %16 : vector<4x16x128xf32>
    %c3_14 = arith.constant 3 : index
    %18 = memref.load %arg2[%c3_14] : memref<9xf32, #tpu.memory_space<smem>>
    %19 = vector.broadcast %18 : f32 to vector<4x16x128xf32>
    %20 = arith.mulf %3, %19 : vector<4x16x128xf32>
    %21 = arith.addf %13, %20 : vector<4x16x128xf32>
    %c6 = arith.constant 6 : index
    %22 = memref.load %arg1[%c6] : memref<9xf32, #tpu.memory_space<smem>>
    %23 = vector.broadcast %22 : f32 to vector<4x16x128xf32>
    %24 = arith.mulf %5, %23 : vector<4x16x128xf32>
    %25 = arith.addf %17, %24 : vector<4x16x128xf32>
    %c6_15 = arith.constant 6 : index
    %26 = memref.load %arg2[%c6_15] : memref<9xf32, #tpu.memory_space<smem>>
    %27 = vector.broadcast %26 : f32 to vector<4x16x128xf32>
    %28 = arith.mulf %5, %27 : vector<4x16x128xf32>
    %29 = arith.addf %21, %28 : vector<4x16x128xf32>
    %c0_16 = arith.constant 0 : index
    %c8 = arith.constant 8 : index
    %c0_17 = arith.constant 0 : index
    %30 = vector.load %arg6[%c0_16, %c8, %c0_17] : memref<4x24x128xf32, #tpu.memory_space<vmem>>, vector<4x16x128xf32>
    tpu.vector_store %arg6[%c0_16, %c8, %c0_17], %29 {strides = array<i32>} : memref<4x24x128xf32, #tpu.memory_space<vmem>>, vector<4x16x128xf32>,
    %c0_18 = arith.constant 0 : index
    %c7 = arith.constant 7 : index
    %c0_19 = arith.constant 0 : index
    %31 = vector.load %arg6[%c0_18, %c7, %c0_19] : memref<4x24x128xf32, #tpu.memory_space<vmem>>, vector<4x16x128xf32>
    %c0_20 = arith.constant 0 : index
    %32 = memref.load %arg3[%c0_20] : memref<3xf32, #tpu.memory_space<smem>>
    %33 = arith.addf %25, %31 : vector<4x16x128xf32>
    %34 = vector.broadcast %32 : f32 to vector<4x16x128xf32>
    %35 = arith.addf %33, %34 : vector<4x16x128xf32>
    %36 = math.tanh %35 : vector<4x16x128xf32>
    %c0_21 = arith.constant 0 : index
    %c0_22 = arith.constant 0 : index
    %c0_23 = arith.constant 0 : index
    %c0_24 = arith.constant 0 : index
    %37 = vector.load %arg5[%c0_21, %c0_22, %c0_23, %c0_24] : memref<4x3x17x128xf32, #tpu.memory_space<vmem>>, vector<4x1x16x128xf32>
    %38 = vector.shape_cast %37 : vector<4x1x16x128xf32> to vector<4x16x128xf32>
    %39 = vector.shape_cast %36 : vector<4x16x128xf32> to vector<4x1x16x128xf32>
    tpu.vector_store %arg5[%c0_21, %c0_22, %c0_23, %c0_24], %39 {strides = array<i32>} : memref<4x3x17x128xf32, #tpu.memory_space<vmem>>, vector<4x1x16x128xf32>,
    %40 = vector.extract_strided_slice %29 {offsets = [0, 15, 0], sizes = [4, 1, 128], strides = [1, 1, 1]} : vector<4x16x128xf32> to vector<4x1x128xf32>
    %41 = vector.shape_cast %40 : vector<4x1x128xf32> to vector<4x128xf32>
    %42 = vector.broadcast %32 : f32 to vector<4x128xf32>
    %43 = arith.addf %41, %42 : vector<4x128xf32>
    %44 = math.tanh %43 : vector<4x128xf32>
    %c0_25 = arith.constant 0 : index
    %c0_26 = arith.constant 0 : index
    %c16 = arith.constant 16 : index
    %c0_27 = arith.constant 0 : index
    %45 = vector.load %arg5[%c0_25, %c0_26, %c16, %c0_27] : memref<4x3x17x128xf32, #tpu.memory_space<vmem>>, vector<4x1x1x128xf32>
    %46 = vector.shape_cast %45 : vector<4x1x1x128xf32> to vector<4x128xf32>
    %47 = vector.shape_cast %44 : vector<4x128xf32> to vector<4x1x1x128xf32>
    tpu.vector_store %arg5[%c0_25, %c0_26, %c16, %c0_27], %47 {strides = array<i32>} : memref<4x3x17x128xf32, #tpu.memory_space<vmem>>, vector<4x1x1x128xf32>,
    %c1_28 = arith.constant 1 : index
    %48 = memref.load %arg1[%c1_28] : memref<9xf32, #tpu.memory_space<smem>>
    %49 = vector.broadcast %48 : f32 to vector<4x16x128xf32>
    %50 = arith.mulf %1, %49 : vector<4x16x128xf32>
    %c1_29 = arith.constant 1 : index
    %51 = memref.load %arg2[%c1_29] : memref<9xf32, #tpu.memory_space<smem>>
    %52 = vector.broadcast %51 : f32 to vector<4x16x128xf32>
    %53 = arith.mulf %1, %52 : vector<4x16x128xf32>
    %c4 = arith.constant 4 : index
    %54 = memref.load %arg1[%c4] : memref<9xf32, #tpu.memory_space<smem>>
    %55 = vector.broadcast %54 : f32 to vector<4x16x128xf32>
    %56 = arith.mulf %3, %55 : vector<4x16x128xf32>
    %57 = arith.addf %50, %56 : vector<4x16x128xf32>
    %c4_30 = arith.constant 4 : index
    %58 = memref.load %arg2[%c4_30] : memref<9xf32, #tpu.memory_space<smem>>
    %59 = vector.broadcast %58 : f32 to vector<4x16x128xf32>
    %60 = arith.mulf %3, %59 : vector<4x16x128xf32>
    %61 = arith.addf %53, %60 : vector<4x16x128xf32>
    %c7_31 = arith.constant 7 : index
    %62 = memref.load %arg1[%c7_31] : memref<9xf32, #tpu.memory_space<smem>>
    %63 = vector.broadcast %62 : f32 to vector<4x16x128xf32>
    %64 = arith.mulf %5, %63 : vector<4x16x128xf32>
    %65 = arith.addf %57, %64 : vector<4x16x128xf32>
    %c7_32 = arith.constant 7 : index
    %66 = memref.load %arg2[%c7_32] : memref<9xf32, #tpu.memory_space<smem>>
    %67 = vector.broadcast %66 : f32 to vector<4x16x128xf32>
    %68 = arith.mulf %5, %67 : vector<4x16x128xf32>
    %69 = arith.addf %61, %68 : vector<4x16x128xf32>
    %c0_33 = arith.constant 0 : index
    %c8_34 = arith.constant 8 : index
    %c0_35 = arith.constant 0 : index
    %70 = vector.load %arg6[%c0_33, %c8_34, %c0_35] : memref<4x24x128xf32, #tpu.memory_space<vmem>>, vector<4x16x128xf32>
    tpu.vector_store %arg6[%c0_33, %c8_34, %c0_35], %69 {strides = array<i32>} : memref<4x24x128xf32, #tpu.memory_space<vmem>>, vector<4x16x128xf32>,
    %c0_36 = arith.constant 0 : index
    %c7_37 = arith.constant 7 : index
    %c0_38 = arith.constant 0 : index
    %71 = vector.load %arg6[%c0_36, %c7_37, %c0_38] : memref<4x24x128xf32, #tpu.memory_space<vmem>>, vector<4x16x128xf32>
    %c1_39 = arith.constant 1 : index
    %72 = memref.load %arg3[%c1_39] : memref<3xf32, #tpu.memory_space<smem>>
    %73 = arith.addf %65, %71 : vector<4x16x128xf32>
    %74 = vector.broadcast %72 : f32 to vector<4x16x128xf32>
    %75 = arith.addf %73, %74 : vector<4x16x128xf32>
    %76 = math.tanh %75 : vector<4x16x128xf32>
    %c0_40 = arith.constant 0 : index
    %c1_41 = arith.constant 1 : index
    %c0_42 = arith.constant 0 : index
    %c0_43 = arith.constant 0 : index
    %77 = vector.load %arg5[%c0_40, %c1_41, %c0_42, %c0_43] : memref<4x3x17x128xf32, #tpu.memory_space<vmem>>, vector<4x1x16x128xf32>
    %78 = vector.shape_cast %77 : vector<4x1x16x128xf32> to vector<4x16x128xf32>
    %79 = vector.shape_cast %76 : vector<4x16x128xf32> to vector<4x1x16x128xf32>
    tpu.vector_store %arg5[%c0_40, %c1_41, %c0_42, %c0_43], %79 {strides = array<i32>} : memref<4x3x17x128xf32, #tpu.memory_space<vmem>>, vector<4x1x16x128xf32>,
    %80 = vector.extract_strided_slice %69 {offsets = [0, 15, 0], sizes = [4, 1, 128], strides = [1, 1, 1]} : vector<4x16x128xf32> to vector<4x1x128xf32>
    %81 = vector.shape_cast %80 : vector<4x1x128xf32> to vector<4x128xf32>
    %82 = vector.broadcast %72 : f32 to vector<4x128xf32>
    %83 = arith.addf %81, %82 : vector<4x128xf32>
    %84 = math.tanh %83 : vector<4x128xf32>
    %c0_44 = arith.constant 0 : index
    %c1_45 = arith.constant 1 : index
    %c16_46 = arith.constant 16 : index
    %c0_47 = arith.constant 0 : index
    %85 = vector.load %arg5[%c0_44, %c1_45, %c16_46, %c0_47] : memref<4x3x17x128xf32, #tpu.memory_space<vmem>>, vector<4x1x1x128xf32>
    %86 = vector.shape_cast %85 : vector<4x1x1x128xf32> to vector<4x128xf32>
    %87 = vector.shape_cast %84 : vector<4x128xf32> to vector<4x1x1x128xf32>
    tpu.vector_store %arg5[%c0_44, %c1_45, %c16_46, %c0_47], %87 {strides = array<i32>} : memref<4x3x17x128xf32, #tpu.memory_space<vmem>>, vector<4x1x1x128xf32>,
    %c2_48 = arith.constant 2 : index
    %88 = memref.load %arg1[%c2_48] : memref<9xf32, #tpu.memory_space<smem>>
    %89 = vector.broadcast %88 : f32 to vector<4x16x128xf32>
    %90 = arith.mulf %1, %89 : vector<4x16x128xf32>
    %c2_49 = arith.constant 2 : index
    %91 = memref.load %arg2[%c2_49] : memref<9xf32, #tpu.memory_space<smem>>
    %92 = vector.broadcast %91 : f32 to vector<4x16x128xf32>
    %93 = arith.mulf %1, %92 : vector<4x16x128xf32>
    %c5 = arith.constant 5 : index
    %94 = memref.load %arg1[%c5] : memref<9xf32, #tpu.memory_space<smem>>
    %95 = vector.broadcast %94 : f32 to vector<4x16x128xf32>
    %96 = arith.mulf %3, %95 : vector<4x16x128xf32>
    %97 = arith.addf %90, %96 : vector<4x16x128xf32>
    %c5_50 = arith.constant 5 : index
    %98 = memref.load %arg2[%c5_50] : memref<9xf32, #tpu.memory_space<smem>>
    %99 = vector.broadcast %98 : f32 to vector<4x16x128xf32>
    %100 = arith.mulf %3, %99 : vector<4x16x128xf32>
    %101 = arith.addf %93, %100 : vector<4x16x128xf32>
    %c8_51 = arith.constant 8 : index
    %102 = memref.load %arg1[%c8_51] : memref<9xf32, #tpu.memory_space<smem>>
    %103 = vector.broadcast %102 : f32 to vector<4x16x128xf32>
    %104 = arith.mulf %5, %103 : vector<4x16x128xf32>
    %105 = arith.addf %97, %104 : vector<4x16x128xf32>
    %c8_52 = arith.constant 8 : index
    %106 = memref.load %arg2[%c8_52] : memref<9xf32, #tpu.memory_space<smem>>
    %107 = vector.broadcast %106 : f32 to vector<4x16x128xf32>
    %108 = arith.mulf %5, %107 : vector<4x16x128xf32>
    %109 = arith.addf %101, %108 : vector<4x16x128xf32>
    %c0_53 = arith.constant 0 : index
    %c8_54 = arith.constant 8 : index
    %c0_55 = arith.constant 0 : index
    %110 = vector.load %arg6[%c0_53, %c8_54, %c0_55] : memref<4x24x128xf32, #tpu.memory_space<vmem>>, vector<4x16x128xf32>
    tpu.vector_store %arg6[%c0_53, %c8_54, %c0_55], %109 {strides = array<i32>} : memref<4x24x128xf32, #tpu.memory_space<vmem>>, vector<4x16x128xf32>,
    %c0_56 = arith.constant 0 : index
    %c7_57 = arith.constant 7 : index
    %c0_58 = arith.constant 0 : index
    %111 = vector.load %arg6[%c0_56, %c7_57, %c0_58] : memref<4x24x128xf32, #tpu.memory_space<vmem>>, vector<4x16x128xf32>
    %c2_59 = arith.constant 2 : index
    %112 = memref.load %arg3[%c2_59] : memref<3xf32, #tpu.memory_space<smem>>
    %113 = arith.addf %105, %111 : vector<4x16x128xf32>
    %114 = vector.broadcast %112 : f32 to vector<4x16x128xf32>
    %115 = arith.addf %113, %114 : vector<4x16x128xf32>
    %116 = math.tanh %115 : vector<4x16x128xf32>
    %c0_60 = arith.constant 0 : index
    %c2_61 = arith.constant 2 : index
    %c0_62 = arith.constant 0 : index
    %c0_63 = arith.constant 0 : index
    %117 = vector.load %arg5[%c0_60, %c2_61, %c0_62, %c0_63] : memref<4x3x17x128xf32, #tpu.memory_space<vmem>>, vector<4x1x16x128xf32>
    %118 = vector.shape_cast %117 : vector<4x1x16x128xf32> to vector<4x16x128xf32>
    %119 = vector.shape_cast %116 : vector<4x16x128xf32> to vector<4x1x16x128xf32>
    tpu.vector_store %arg5[%c0_60, %c2_61, %c0_62, %c0_63], %119 {strides = array<i32>} : memref<4x3x17x128xf32, #tpu.memory_space<vmem>>, vector<4x1x16x128xf32>,
    %120 = vector.extract_strided_slice %109 {offsets = [0, 15, 0], sizes = [4, 1, 128], strides = [1, 1, 1]} : vector<4x16x128xf32> to vector<4x1x128xf32>
    %121 = vector.shape_cast %120 : vector<4x1x128xf32> to vector<4x128xf32>
    %122 = vector.broadcast %112 : f32 to vector<4x128xf32>
    %123 = arith.addf %121, %122 : vector<4x128xf32>
    %124 = math.tanh %123 : vector<4x128xf32>
    %c0_64 = arith.constant 0 : index
    %c2_65 = arith.constant 2 : index
    %c16_66 = arith.constant 16 : index
    %c0_67 = arith.constant 0 : index
    %125 = vector.load %arg5[%c0_64, %c2_65, %c16_66, %c0_67] : memref<4x3x17x128xf32, #tpu.memory_space<vmem>>, vector<4x1x1x128xf32>
    %126 = vector.shape_cast %125 : vector<4x1x1x128xf32> to vector<4x128xf32>
    %127 = vector.shape_cast %124 : vector<4x128xf32> to vector<4x1x1x128xf32>
    tpu.vector_store %arg5[%c0_64, %c2_65, %c16_66, %c0_67], %127 {strides = array<i32>} : memref<4x3x17x128xf32, #tpu.memory_space<vmem>>, vector<4x1x1x128xf32>,
    return
  }
  func.func @transform_0(%arg0: i32) -> i32 {
    %c0_i32 = arith.constant 0 : i32
    %c0_i32_0 = arith.constant 0 : i32
    return %c0_i32 : i32
  }
  func.func @transform_1(%arg0: i32) -> i32 {
    %c0_i32 = arith.constant 0 : i32
    %c0_i32_0 = arith.constant 0 : i32
    return %c0_i32 : i32
  }
  func.func @transform_2(%arg0: i32) -> i32 {
    %c0_i32 = arith.constant 0 : i32
    %c0_i32_0 = arith.constant 0 : i32
    return %c0_i32 : i32
  }
  func.func @transform_3(%arg0: i32) -> (i32, i32, i32, i32) {
    %c0_i32 = arith.constant 0 : i32
    %c0_i32_0 = arith.constant 0 : i32
    %c0_i32_1 = arith.constant 0 : i32
    %c0_i32_2 = arith.constant 0 : i32
    return %arg0, %c0_i32, %c0_i32_0, %c0_i32_1 : i32, i32, i32, i32
  }
  func.func @transform_4(%arg0: i32) -> (i32, i32, i32, i32) {
    %c0_i32 = arith.constant 0 : i32
    %c0_i32_0 = arith.constant 0 : i32
    %c0_i32_1 = arith.constant 0 : i32
    %c0_i32_2 = arith.constant 0 : i32
    return %arg0, %c0_i32, %c0_i32_0, %c0_i32_1 : i32, i32, i32, i32
  }
}

</mosaic_0001>

<bundles_post_ra>
// kernel: tpu_custom_call.1
= control target key start
LH: loop header
LB: loop body
LE: loop exit
PB: predicated region body
PF: predicated region fallthrough
CT: control target
= control target key end

     0   :  { %9 = vsyncpa [#allocation5], 0  ;;  %s1998_s0 = inlined_call_operand.hbm [shape: f32[9], index: 0, kind: input, shape index: {}]   ;;  %s1999_s1 = inlined_call_operand.vmem [shape: f32[9], index: 1, kind: input, shape index: {}]   ;;  %s2000_s2 = inlined_call_operand.vmem [shape: f32[3], index: 2, kind: input, shape index: {}]   ;;  %s2001_s3 = inlined_call_operand.hbm [shape: f32[8,3,16,128], index: 3, kind: input, shape index: {}]   ;;  %s2002_s4 = inlined_call_operand.vmem [shape: f32[8,3,17,128], index: 4, kind: output, shape index: {}]  }
   0x1   :  { %10 = vsyncpa [#allocation6], 0 }
   0x2   :  { %11 = vsyncpa [#allocation9], 0 }
   0x3   :  { %12 = vsyncpa [#allocation4], 0 }
   0x4   :  { %14 = vsyncpa [#allocation4 + $0x1], 0  ;;  %s1236_s15 = smov 0   ;;  %s1238_s16 = smov 0  }
   0x5   :  { %s1240_s17 = smov 0   ;;  %s1242_s18 = smov 0  }
   0x6 LB: > { %s858_s19 = sadd.s32 4294967295, %s1202_s18   ;;  %p103_p0 = scmp.ne.s32.totalorder %s1194_s16, %s1190_s15  ;;  %s1202_s18 = sphi %s1242_s18, %s2028_s18   ;;  %s1198_s17 = sphi %s1240_s17, %s2027_s17   ;;  %s1194_s16 = sphi %s1238_s16, %s2026_s16   ;;  %s1190_s15 = sphi %s1236_s15, %s2025_s15  }
   0x7   : > { %p1258_p1 = scmp.eq.s32.totalorder %s858_s19, 0  ;;  %p860_p2 = scmp.ge.s32.totalorder %s1202_s18, 1 }
   0x8   : > { %p140_p3 = scmp.lt.s32.totalorder %s1202_s18, 3  ;;  %s162_s25 = sshll.u32 %s1999_s1, 4  ;;  %s163_s25 = int_to_ptr.vmem [resolvable:$true] %s162_s25 }
   0x9   : > { %s2006_s20 = scalar_select %p1258_p1, 1, 0 }
   0xa   : > { %p1266_p4 = por %p1258_p1, %p103_p0  ;;  %p1270_p5 = pnand %p860_p2, %p140_p3 }
   0xb   : > { %s173_s28 = sshll.u32 %s2000_s2, 4  ;;  %s1291_s30 = sadd.s32 1, %s1202_s18   ;;  %s1288_s28 = int_to_ptr.vmem [resolvable:$true] %s173_s28 }
   0xc   : > { %s2007_s21 = scalar_select %p1266_p4, 1, 0 }
   0xd   : > { %p952_p6 = pneg %p1270_p5  ;;  %s1083_s7 = scalar_lea.hbm %s1998_s0, 16 }
   0xe   : > { %p1084_p8 = scmp.ne.s32.totalorder %s1998_s0, %s1083_s7  ;;  %p1090_p12 = scmp.lt.u32.totalorder %s1083_s7, %s1998_s0 }
   0xf   : > { %p1284_p7 = pnand %p952_p6, %p1258_p1 }
  0x11   : > { %p1085_p9 = pneg %p1284_p7 }
  0x13   : > { %p1086_p10 = pnand %p1085_p9, %p1084_p8 }
  0x15   : > { %p1087_p11 = pneg %p1086_p10 }
  0x17   : > { %p1092_p13 = pnand %p1090_p12, %p1087_p11 }
  0x19   : > { %1095 = shalt.err (!%p1092_p13)
}
  0x1a   : > { %s1204_s12 = smov [#allocation3]   ;;  %s1096_s15 = scalar_lea.vmem %s163_s25, 16 }
  0x1b   : > { %955 = dma.hbm_to_smem (!%p1284_p7), %s1998_s0, 16, %s1204_s12, [#allocation5]  }
  0x1c   : > { %p1097_p0 = scmp.ne.s32.totalorder %s163_s25, %s1096_s15  ;;  %p1104_p6 = scmp.lt.s32.totalorder %s163_s25, %s163_s25 }
  0x1d   : > { %p1105_p8 = scmp.lt.s32.totalorder %s1096_s15, %s1096_s15 }
  0x1e   : > { %p1099_p2 = pnand %p1097_p0, %p1085_p9 }
  0x1f   : > { %p1106_p10 = por %p1105_p8, %p1104_p6 }
  0x20   : > { %p1100_p3 = pneg %p1099_p2 }
  0x22   : > { %p1107_p4 = pnand %p1106_p10, %p1100_p3 }
  0x24   : > { %1110 = shalt.err (!%p1107_p4)
}
  0x25   : > { %s1205_s23 = smov [#allocation7]   ;;  %s1111_s24 = scalar_lea.vmem %s1288_s28, 16 }
  0x26   : > { %958 = dma.vmem_to_smem (!%p1284_p7), %s163_s25, 16, %s1205_s23, [#allocation6]  }
  0x27   : > { %p1112_p11 = scmp.ne.s32.totalorder %s1288_s28, %s1111_s24  ;;  %p1119_p0 = scmp.lt.s32.totalorder %s1288_s28, %s1288_s28 }
  0x28   : > { %p1120_p2 = scmp.lt.s32.totalorder %s1111_s24, %s1111_s24 }
  0x29   : > { %p1114_p12 = pnand %p1112_p11, %p1085_p9 }
  0x2a   : > { %p1121_p6 = por %p1120_p2, %p1119_p0 }
  0x2b   : > { %p1115_p13 = pneg %p1114_p12 }
  0x2d   : > { %p1122_p3 = pnand %p1121_p6, %p1115_p13 }
  0x2f   : > { %1125 = shalt.err (!%p1122_p3)
}
  0x30   : > { %s1206_s26 = smov [#allocation8]   ;;  %s87_s25 = ssub.s32 %s1202_s18, %s1291_s30 }
  0x31   : > { %961 = dma.vmem_to_smem (!%p1284_p7), %s1288_s28, 16, %s1206_s26, [#allocation9]  }
  0x32   : > { %s90_s27 = sadd.s32 1, %s1198_s17  ;;  %p88_p4 = scmp.eq.s32.totalorder %s87_s25, 0 }
  0x33   : > { %p97_p9 = scmp.ne.s32.totalorder %s1198_s17, %s1194_s16  ;;  %p98_p8 = scmp.eq.s32.totalorder %s1202_s18, 0 }
  0x34   : > { %p969_p10 = scmp.lt.s32.totalorder %s1202_s18, 2  ;;  %s184_s29 = sand.u32 1, %s1198_s17  }
  0x35   : > { %s1335_s5 = scalar_select %p88_p4, %s1198_s17, %s90_s27  }
  0x36   : > { %p99_p11 = por %p98_p8, %p97_p9  ;;  %s934_s6 = smul.u32 192, %s184_s29 }
  0x37   : > { %s935_s7 = smul.u32 3072, %s1202_s18  ;;  %s1350_s13 = scalar_lea.sflag [#allocation4], %s184_s29 }
  0x38   : > { %p1339_p12 = pnand %p969_p10, %p99_p11  ;;  %s188_s11 = scalar_lea.vmem [#allocation10], %s934_s6 }
  0x39   : > { %s1346_s28 = scalar_lea.hbm %s2001_s3, %s935_s7  ;;  %s196_s12 = sshll.u32 %s188_s11, 4  ;;  %s1348_s12 = int_to_ptr.vmem [resolvable:$true] %s196_s12 }
  0x3a   : > { %s1126_s14 = scalar_lea.hbm %s1346_s28, 3072  ;;  %p1128_p13 = pneg %p1339_p12 }
  0x3b   : > { %p1127_p7 = scmp.ne.s32.totalorder %s1346_s28, %s1126_s14  ;;  %s1131_s24 = scalar_lea.hbm %s2001_s3, 6144 }
  0x3c   : > { %p1132_p6 = scmp.lt.u32.totalorder %s1346_s28, %s2001_s3  ;;  %p1133_p3 = scmp.lt.u32.totalorder %s1131_s24, %s1126_s14 }
  0x3d   : > { %p1129_p0 = pnand %p1128_p13, %p1127_p7  ;;  %p1135_p9 = scmp.lt.u32.totalorder %s1126_s14, %s1346_s28 }
  0x3e   : > { %p1134_p4 = por %p1133_p3, %p1132_p6 }
  0x3f   : > { %p1130_p2 = pneg %p1129_p0 }
  0x40   : > { %p1136_p8 = por %p1135_p9, %p1134_p4 }
  0x42   : > { %p1137_p10 = pnand %p1136_p8, %p1130_p2 }
  0x44   : > { %1140 = shalt.err (!%p1137_p10)
}
  0x45   : > { %s1141_s27 = scalar_lea.vmem %s1348_s12, 3072  ;;  %s1207_s29 = smov [#allocation10]  }
  0x46   : > { %p1142_p11 = scmp.ne.s32.totalorder %s1348_s12, %s1141_s27  ;;  %s1146_s6 = sshll.u32 %s1207_s29, 4  ;;  %s1147_s6 = int_to_ptr.vmem [resolvable:$false] %s1146_s6 }
  0x47   : > { %s1148_s7 = scalar_lea.vmem %s1147_s6, 6144  ;;  %p1149_p1 = scmp.lt.s32.totalorder %s1348_s12, %s1147_s6 }
  0x48   : > { %p1144_p7 = pnand %p1142_p11, %p1128_p13  ;;  %p1150_p6 = scmp.lt.s32.totalorder %s1148_s7, %s1141_s27 }
  0x4a   : > { %p1145_p0 = pneg %p1144_p7  ;;  %p1151_p3 = por %p1150_p6, %p1149_p1 }
  0x4c   : > { %p1152_p4 = pnand %p1151_p3, %p1145_p0 }
  0x4e   : > { %1155 = shalt.err (!%p1152_p4)
}
  0x4f   : > { %s1208_s9 = smov 128   ;;  %s1209_s10 = smov 8  }
  0x50   : > { %965 = dma.hbm_to_vmem [thread:$0]  (!%p1339_p12), %s1346_s28, 3072, %s1348_s12, %s1350_s13, %s1208_s9, %s1208_s9, %s1209_s10  }
  0x51   : > { %208 = sbr.rel (%p1270_p5) target bundleno = 214 (0xd6), region = 36 }
  0x58   : > { %p2011_p13 = scmp.ne.s32.totalorder %s2006_s20, 0 }
  0x5a   : > { %1173 = dma.done.wait (%p2011_p13), [#allocation5], 16  }
  0x5b   : > { %1175 = vsyncadd (%p2011_p13), [#allocation5], 4294967280 }
  0x5c   : > { %1177 = dma.done.wait (%p2011_p13), [#allocation6], 16  }
  0x5d   : > { %1179 = vsyncadd (%p2011_p13), [#allocation6], 4294967280 }
  0x5e   : > { %1181 = dma.done.wait (%p2011_p13), [#allocation9], 16  }
  0x5f   : > { %1183 = vsyncadd (%p2011_p13), [#allocation9], 4294967280  ;;  %s222_s22 = sand.u32 1, %s1194_s16   ;;  %p2012_p1 = scmp.ne.s32.totalorder %s2007_s21, 0 }
  0x60   : > { %s936_s8 = smul.u32 192, %s222_s22  ;;  %s223_s28 = scalar_lea.sflag [#allocation4], %s222_s22 }
  0x62   : > { %s1393_s11 = scalar_lea.vmem [#allocation10], %s936_s8 }
  0x63   : > { %1185 = dma.done.wait (%p2012_p1), %s223_s28, 3072  }
  0x64   : > { %1187 = vsyncadd (%p2012_p1), %s223_s28, 4294964224 }
  0x65   : > { %231 = sfence }
  0x66   : > { %s301_s12 = sld [smem:[#allocation7]]  ;;  %v1210_v0 = vmov 0.0   ;;  %s891_s20 = sld [smem:[#allocation7 + $0x3]]  ;;  %v1400_v1 = vld [vmem:[%s1393_s11] sm:$0xff]  ;;  %v1403_v2 = vld [vmem:[%s1393_s11 + $0x10] sm:$0xff]  ;;  %v1406_v3 = vld [vmem:[%s1393_s11 + $0x8] sm:$0xff] }
  0x67   : > { %287 = vst [vmem:[#allocation2] sm:$0xff] %v1210_v0  ;;  %288 = vst [vmem:[#allocation2 + $0x18] sm:$0xff] %v1210_v0  ;;  %s893_s13 = sld [smem:[#allocation7 + $0x6]]  ;;  %s399_s21 = sld [smem:[#allocation8]]  ;;  %v1409_v4 = vld [vmem:[%s1393_s11 + $0x20] sm:$0xff]  ;;  %v1412_v5 = vld [vmem:[%s1393_s11 + $0x18] sm:$0xff] }
  0x68   : > { %289 = vst [vmem:[#allocation2 + $0x30] sm:$0xff] %v1210_v0  ;;  %290 = vst [vmem:[#allocation2 + $0x48] sm:$0xff] %v1210_v0  ;;  %s913_s14 = sld [smem:[#allocation3 + $0x2]]  ;;  %s915_s15 = sld [smem:[#allocation3 + $0x5]]  ;;  %v1415_v6 = vld [vmem:[%s1393_s11 + $0x28] sm:$0xff]  ;;  %v1420_v8 = vld [vmem:[%s1393_s11 + $0x30] sm:$0xff] }
  0x69   : > { %s917_s23 = sld [smem:[#allocation3 + $0x8]]  ;;  %v1423_v9 = vld [vmem:[%s1393_s11 + $0x40] sm:$0xff]  ;;  %v1426_v10 = vld [vmem:[%s1393_s11 + $0x50] sm:$0xff]  ;;  %v1453_v23 = vld [vmem:[%s1393_s11 + $0x38] sm:$0xff]  ;;  %s1473_s24 = sshll.u32 %s858_s19, 2 }
  0x6a   : > { %v1460_v28 = vld [vmem:[%s1393_s11 + $0x48] sm:$0xff]  ;;  %v1463_v29 = vld [vmem:[%s1393_s11 + $0x58] sm:$0xff]  ;;  %v1480_v38 = vld [vmem:[%s1393_s11 + $0x60] sm:$0xff]  ;;  %p255_p5 = scmp.lt.s32.totalorder %s1473_s24, 7  ;;  %s1528_s18 = sld [smem:[#allocation3]] }
  0x6b   : > { %v1483_v39 = vld [vmem:[%s1393_s11 + $0x70] sm:$0xff]  ;;  %v1490_v44 = vld [vmem:[%s1393_s11 + $0x80] sm:$0xff]  ;;  %v1505_v52 = vld [vmem:[%s1393_s11 + $0x68] sm:$0xff]  ;;  %s1552_s19 = sld [smem:[#allocation3 + $0x3]]  ;;  %s1554_s26 = sld [smem:[#allocation3 + $0x6]] }
  0x6c   : > { %v1417_v7 = vstv %s301_s12  ;;  %v1430_v12 = vstv %s891_s20  ;;  %v1508_v53 = vld [vmem:[%s1393_s11 + $0x78] sm:$0xff]  ;;  %v1511_v54 = vld [vmem:[%s1393_s11 + $0x88] sm:$0xff]  ;;  %s2030_s24 = smov (!%p255_p5, %s1473_s24), 7  ;;  %s1568_s25 = sld [smem:[#allocation7 + $0x1]] }
  0x6d   : > { %v303_v11 = vmul.f32 %v1417_v7, %v1400_v1  ;;  %v1432_v13 = vstv %s893_s13  ;;  %v304_v14 = vmul.f32 %v1417_v7, %v1406_v3  ;;  %v331_v15 = vmul.f32 %v1403_v2, %v1430_v12  ;;  %v1526_v62 = vld [vmem:[%s1393_s11 + $0x90] sm:$0xff]  ;;  %s1570_s27 = sld [smem:[#allocation7 + $0x4]]  ;;  %s937_s29 = smul.u32 72, %s2030_s24 }
  0x6e   : > { %v367_v16 = vmul.f32 %v1409_v4, %v1432_v13  ;;  %v332_v17 = vmul.f32 %v1412_v5, %v1430_v12  ;;  %v368_v18 = vmul.f32 %v1415_v6, %v1432_v13  ;;  %v1444_v19 = vstv %s399_s21  ;;  %s1592_s6 = sld [smem:[#allocation7 + $0x7]]  ;;  %s1619_s22 = sld [smem:[#allocation8 + $0x1]] }
  0x6f   : > { %v305_v20 = vmul.f32 %v1417_v7, %v1420_v8  ;;  %v333_v21 = vmul.f32 %v1423_v9, %v1430_v12  ;;  %v369_v22 = vmul.f32 %v1426_v10, %v1432_v13  ;;  %v339_v24 = vadd.f32 %v331_v15, %v303_v11  ;;  %v1539_v15 = vld [vmem:[%s1393_s11 + $0xa0] sm:$0xff]  ;;  %s1613_s10 = scalar_lea.vmem %s2002_s4, %s937_s29  ;;  %s1725_s8 = sld [smem:[#allocation3 + $0x1]] }
  0x70   : > { %v340_v25 = vadd.f32 %v332_v17, %v304_v14  ;;  %v1455_v26 = vstv %s913_s14  ;;  %v1457_v27 = vstv %s915_s15  ;;  %v1469_v33 = vstv %s917_s23  ;;  %s1733_s28 = sld [smem:[#allocation3 + $0x4]]  ;;  %s1749_s12 = sld [smem:[#allocation7 + $0x2]] }
  0x71   : > { %v341_v30 = vadd.f32 %v333_v21, %v305_v20  ;;  %v604_v31 = vmul.f32 %v1455_v26, %v1420_v8  ;;  %v624_v32 = vmul.f32 %v1423_v9, %v1457_v27  ;;  %v375_v34 = vadd.f32 %v367_v16, %v339_v24  ;;  %v1542_v16 = vld [vmem:[%s1393_s11 + $0xb0] sm:$0xff]  ;;  %s1762_s20 = sld [smem:[#allocation7 + $0x5]]  ;;  %s1764_s13 = sld [smem:[#allocation7 + $0x8]] }
  0x72   : > { %v376_v35 = vadd.f32 %v368_v18, %v340_v25  ;;  %v660_v36 = vmul.f32 %v1426_v10, %v1469_v33  ;;  %v306_v37 = vmul.f32 %v1417_v7, %v1453_v23  ;;  %v334_v42 = vmul.f32 %v1460_v28, %v1430_v12  ;;  %s1773_s21 = sld [smem:[#allocation8 + $0x2]] }
  0x73   : > { %v377_v40 = vadd.f32 %v369_v22, %v341_v30  ;;  %v632_v41 = vadd.f32 %v624_v32, %v604_v31  ;;  %v370_v43 = vmul.f32 %v1463_v29, %v1432_v13  ;;  %383 = vst [vmem:[#allocation2 + $0x8] sm:$0xff] %v375_v34  ;;  %v605_v46 = vmul.f32 %v1455_v26, %v1453_v23  ;;  %v1563_v31 = vld [vmem:[%s1393_s11 + $0x98] sm:$0xff]  ;;  %v1566_v32 = vld [vmem:[%s1393_s11 + $0xa8] sm:$0xff] }
  0x74   : > { %384 = vst [vmem:[#allocation2 + $0x10] sm:$0xff] %v376_v35  ;;  %v433_v45 = vadd.f32 %v1444_v19, %v376_v35  ;;  %v625_v47 = vmul.f32 %v1460_v28, %v1457_v27  ;;  %v342_v49 = vadd.f32 %v334_v42, %v306_v37  ;;  %v307_v50 = vmul.f32 %v1417_v7, %v1480_v38  ;;  %v1579_v37 = vld [vmem:[%s1393_s11 + $0xb8] sm:$0xff]  ;;  %s1735_s11 = sld [smem:[#allocation3 + $0x7]] }
  0x75   : > { %385 = vst [vmem:[#allocation2 + $0x20] sm:$0xff] %v377_v40  ;;  %v1498_v48 = vadd.f32 %v660_v36, %v632_v41  ;;  %v335_v51 = vmul.f32 %v1483_v39, %v1430_v12  ;;  %v1515_v55 = vmul.f32 %v1463_v29, %v1469_v33  ;;  %v371_v56 = vmul.f32 %v1490_v44, %v1432_v13 }
  0x76   : > { %1011 = vtanh.f32 %v433_v45  ;;  %v606_v57 = vmul.f32 %v1455_v26, %v1480_v38  ;;  %v378_v58 = vadd.f32 %v370_v43, %v342_v49  ;;  %v626_v60 = vmul.f32 %v1483_v39, %v1457_v27 }
  0x77   : > { %v343_v59 = vadd.f32 %v335_v51, %v307_v50  ;;  %v662_v61 = vmul.f32 %v1490_v44, %v1469_v33  ;;  %v1530_v63 = vadd.f32 %v625_v47, %v605_v46  ;;  %v308_v0 = vmul.f32 %v1417_v7, %v1505_v52 }
  0x78   : > { %v336_v11 = vmul.f32 %v1508_v53, %v1430_v12  ;;  %v372_v14 = vmul.f32 %v1511_v54, %v1432_v13  ;;  %386 = vst [vmem:[#allocation2 + $0x28] sm:$0xff] %v378_v58  ;;  %v434_v17 = vadd.f32 %v1444_v19, %v378_v58  ;;  %v634_v20 = vadd.f32 %v626_v60, %v606_v57 }
  0x79   : > { %v379_v18 = vadd.f32 %v371_v56, %v343_v59  ;;  %v607_v21 = vmul.f32 %v1455_v26, %v1505_v52  ;;  %v627_v24 = vmul.f32 %v1508_v53, %v1457_v27  ;;  %v663_v25 = vmul.f32 %v1511_v54, %v1469_v33 }
  0x7a   : > { %v344_v22 = vadd.f32 %v336_v11, %v308_v0  ;;  %v309_v30 = vmul.f32 %v1417_v7, %v1526_v62  ;;  %1013 = vtanh.f32 %v434_v17  ;;  %v1572_v34 = vadd.f32 %v662_v61, %v634_v20 }
  0x7b   : > { %387 = vst [vmem:[#allocation2 + $0x38] sm:$0xff] %v379_v18  ;;  %v337_v35 = vmul.f32 %v1539_v15, %v1430_v12  ;;  %v373_v36 = vmul.f32 %v1542_v16, %v1432_v13  ;;  %v635_v41 = vadd.f32 %v627_v24, %v607_v21  ;;  %v608_v42 = vmul.f32 %v1455_v26, %v1526_v62 }
  0x7c   : > { %v380_v40 = vadd.f32 %v372_v14, %v344_v22  ;;  %v628_v43 = vmul.f32 %v1539_v15, %v1457_v27  ;;  %v664_v46 = vmul.f32 %v1542_v16, %v1469_v33  ;;  %v310_v47 = vmul.f32 %v1417_v7, %v1563_v31 }
  0x7d   : > { %v345_v45 = vadd.f32 %v337_v35, %v309_v30  ;;  %v338_v49 = vmul.f32 %v1566_v32, %v1430_v12  ;;  %v1595_v51 = vadd.f32 %v663_v25, %v635_v41  ;;  %v374_v57 = vmul.f32 %v1579_v37, %v1432_v13 }
  0x7e   : > { %388 = vst [vmem:[#allocation2 + $0x40] sm:$0xff] %v380_v40  ;;  %v435_v50 = vadd.f32 %v1444_v19, %v380_v40  ;;  %v636_v56 = vadd.f32 %v628_v43, %v608_v42  ;;  %v609_v7 = vmul.f32 %v1455_v26, %v1563_v31  ;;  %v629_v12 = vmul.f32 %v1566_v32, %v1457_v27 }
  0x7f   : > { %2013 = vst [vmem:[#allocation15_spill] sm:$0xff] %v1595_v51  ;;  %v381_v58 = vadd.f32 %v373_v36, %v345_v45  ;;  %v346_v59 = vadd.f32 %v338_v49, %v310_v47  ;;  %v665_v0 = vmul.f32 %v1579_v37, %v1469_v33  ;;  %v1608_v13 = vstv %s1528_s18 }
  0x80   : > { %v1012_v60 = vpop.eup %1011  ;;  %1015 = vtanh.f32 %v435_v50  ;;  %v1603_v61 = vadd.f32 %v664_v46, %v636_v56  ;;  %v637_v14 = vadd.f32 %v629_v12, %v609_v7  ;;  %v293_v17 = vmul.f32 %v1608_v13, %v1400_v1  ;;  %v391_v50 = vld [vmem:[#allocation2 + $0x7] sm:$0xff] }
  0x81   : > { %389 = vst [vmem:[#allocation2 + $0x50] sm:$0xff] %v381_v58  ;;  %v382_v11 = vadd.f32 %v374_v57, %v346_v59  ;;  %v294_v18 = vmul.f32 %v1608_v13, %v1406_v3  ;;  %441 = vst [vmem:[%s1613_s10 + $0x9] sm:$0x80] %v1012_v60  ;;  %v1623_v20 = vstv %s1552_s19  ;;  %v1626_v21 = vstv %s1554_s26 }
  0x82   : > { %v1629_v22 = vstv %s1568_s25  ;;  %v1632_v24 = vstv %s1570_s27  ;;  %v1635_v30 = vadd.f32 %v665_v0, %v637_v14  ;;  %v313_v35 = vmul.f32 %v1403_v2, %v1623_v20  ;;  %v1665_v0 = vld [vmem:[#allocation2 + $0xf] sm:$0xff] }
  0x83   : > { %390 = vst [vmem:[#allocation2 + $0x58] sm:$0xff] %v382_v11  ;;  %v436_v25 = vadd.f32 %v1444_v19, %v382_v11  ;;  %v314_v36 = vmul.f32 %v1412_v5, %v1623_v20  ;;  %v349_v40 = vmul.f32 %v1409_v4, %v1626_v21  ;;  %v350_v41 = vmul.f32 %v1415_v6, %v1626_v21 }
  0x84   : > { %2014 = vst [vmem:[#allocation16_spill] sm:$0xff] %v1635_v30  ;;  %v457_v42 = vmul.f32 %v1629_v22, %v1400_v1  ;;  %v485_v43 = vmul.f32 %v1403_v2, %v1632_v24  ;;  %v1014_v45 = vpop.eup %1013  ;;  %v321_v46 = vadd.f32 %v313_v35, %v293_v17  ;;  %v1650_v49 = vstv %s1592_s6 }
  0x85   : > { %1017 = vtanh.f32 %v436_v25  ;;  %v322_v47 = vadd.f32 %v314_v36, %v294_v18  ;;  %v521_v57 = vmul.f32 %v1409_v4, %v1650_v49  ;;  %v458_v58 = vmul.f32 %v1629_v22, %v1406_v3  ;;  %442 = vst [vmem:[%s1613_s10 + $0x51] sm:$0x80] %v1014_v45 }
  0x86   : > { %v493_v56 = vadd.f32 %v485_v43, %v457_v42  ;;  %v486_v59 = vmul.f32 %v1412_v5, %v1632_v24  ;;  %v1661_v7 = vadd.f32 %v1515_v55, %v1530_v63  ;;  %v357_v12 = vadd.f32 %v349_v40, %v321_v46 }
  0x87   : > { %v1663_v60 = vadd.f32 %v350_v41, %v322_v47  ;;  %v522_v11 = vmul.f32 %v1415_v6, %v1650_v49  ;;  %v295_v18 = vmul.f32 %v1608_v13, %v1420_v8  ;;  %v296_v25 = vmul.f32 %v1608_v13, %v1453_v23 }
  0x88   : > { %2015 = vst [vmem:[#allocation17_spill] sm:$0xff] %v1661_v7  ;;  %v529_v14 = vadd.f32 %v521_v57, %v493_v56  ;;  %v494_v17 = vadd.f32 %v486_v59, %v458_v58  ;;  %v400_v35 = vadd.f32 %v391_v50, %v357_v12  ;;  %v1674_v55 = vstv %s1619_s22  ;;  %v393_v58 = vld [vmem:[#allocation2 + $0x1f] sm:$0xff]  ;;  %v394_v59 = vld [vmem:[#allocation2 + $0x27] sm:$0xff] }
  0x89   : > { %v315_v63 = vmul.f32 %v1423_v9, %v1623_v20  ;;  %v316_v36 = vmul.f32 %v1460_v28, %v1623_v20  ;;  %v351_v42 = vmul.f32 %v1426_v10, %v1626_v21  ;;  %v352_v43 = vmul.f32 %v1463_v29, %v1626_v21 }
  0x8a   : > { %v1016_v40 = vpop.eup %1015  ;;  %537 = vst [vmem:[#allocation2 + $0x8] sm:$0xff] %v529_v14  ;;  %v530_v41 = vadd.f32 %v522_v11, %v494_v17  ;;  %v459_v45 = vmul.f32 %v1629_v22, %v1420_v8  ;;  %v409_v46 = vadd.f32 %v1444_v19, %v400_v35  ;;  %v487_v56 = vmul.f32 %v1423_v9, %v1632_v24 }
  0x8b   : > { %v323_v47 = vadd.f32 %v315_v63, %v295_v18  ;;  %v324_v50 = vadd.f32 %v316_v36, %v296_v25  ;;  %443 = vst [vmem:[%s1613_s10 + $0x99] sm:$0x80] %v1016_v40  ;;  %v523_v12 = vmul.f32 %v1426_v10, %v1650_v49  ;;  %v460_v11 = vmul.f32 %v1629_v22, %v1453_v23 }
  0x8c   : > { %538 = vst [vmem:[#allocation2 + $0x10] sm:$0xff] %v530_v41  ;;  %v588_v57 = vadd.f32 %v1674_v55, %v530_v41  ;;  %v488_v14 = vmul.f32 %v1460_v28, %v1632_v24  ;;  %1019 = vtanh.f32 %v409_v46  ;;  %v495_v25 = vadd.f32 %v487_v56, %v459_v45 }
  0x8d   : > { %v359_v17 = vadd.f32 %v351_v42, %v323_v47  ;;  %v360_v18 = vadd.f32 %v352_v43, %v324_v50  ;;  %v524_v63 = vmul.f32 %v1463_v29, %v1650_v49  ;;  %v297_v36 = vmul.f32 %v1608_v13, %v1480_v38 }
  0x8e   : > { %1021 = vtanh.f32 %v588_v57  ;;  %v496_v35 = vadd.f32 %v488_v14, %v460_v11  ;;  %v531_v51 = vadd.f32 %v523_v12, %v495_v25  ;;  %v298_v7 = vmul.f32 %v1608_v13, %v1505_v52 }
  0x8f   : > { %v1018_v40 = vpop.eup %1017  ;;  %v402_v41 = vadd.f32 %v393_v58, %v359_v17  ;;  %v403_v30 = vadd.f32 %v394_v59, %v360_v18  ;;  %v317_v42 = vmul.f32 %v1483_v39, %v1623_v20  ;;  %v318_v43 = vmul.f32 %v1508_v53, %v1623_v20 }
  0x90   : > { %v532_v46 = vadd.f32 %v524_v63, %v496_v35  ;;  %v353_v45 = vmul.f32 %v1490_v44, %v1626_v21  ;;  %444 = vst [vmem:[%s1613_s10 + $0xe1] sm:$0x80] %v1018_v40  ;;  %539 = vst [vmem:[#allocation2 + $0x20] sm:$0xff] %v531_v51  ;;  %v354_v56 = vmul.f32 %v1511_v54, %v1626_v21  ;;  %v396_v35 = vld [vmem:[#allocation2 + $0x3f] sm:$0xff] }
  0x91   : > { %v411_v47 = vadd.f32 %v1444_v19, %v402_v41  ;;  %v412_v50 = vadd.f32 %v1444_v19, %v403_v30  ;;  %v461_v57 = vmul.f32 %v1629_v22, %v1480_v38  ;;  %v325_v59 = vadd.f32 %v317_v42, %v297_v36 }
  0x92   : > { %540 = vst [vmem:[#allocation2 + $0x28] sm:$0xff] %v532_v46  ;;  %v589_v58 = vadd.f32 %v1674_v55, %v532_v46  ;;  %v326_v12 = vadd.f32 %v318_v43, %v298_v7  ;;  %v489_v11 = vmul.f32 %v1483_v39, %v1632_v24  ;;  %v525_v14 = vmul.f32 %v1490_v44, %v1650_v49  ;;  %v395_v7 = vld [vmem:[#allocation2 + $0x37] sm:$0xff] }
  0x93   : > { %1023 = vtanh.f32 %v411_v47  ;;  %v462_v51 = vmul.f32 %v1629_v22, %v1505_v52  ;;  %v490_v30 = vmul.f32 %v1508_v53, %v1632_v24  ;;  %v361_v17 = vadd.f32 %v353_v45, %v325_v59 }
  0x94   : > { %1025 = vtanh.f32 %v412_v50  ;;  %v362_v18 = vadd.f32 %v354_v56, %v326_v12  ;;  %v497_v25 = vadd.f32 %v489_v11, %v461_v57  ;;  %v526_v36 = vmul.f32 %v1511_v54, %v1650_v49 }
  0x95   : > { %1027 = vtanh.f32 %v589_v58  ;;  %v498_v63 = vadd.f32 %v490_v30, %v462_v51  ;;  %v299_v40 = vmul.f32 %v1608_v13, %v1526_v62  ;;  %v404_v41 = vadd.f32 %v395_v7, %v361_v17 }
  0x96   : > { %v405_v46 = vadd.f32 %v396_v35, %v362_v18  ;;  %v533_v42 = vadd.f32 %v525_v14, %v497_v25  ;;  %v300_v43 = vmul.f32 %v1608_v13, %v1563_v31  ;;  %v1020_v45 = vpop.eup %1019  ;;  %v319_v50 = vmul.f32 %v1539_v15, %v1623_v20 }
  0x97   : > { %v534_v47 = vadd.f32 %v526_v36, %v498_v63  ;;  %v320_v56 = vmul.f32 %v1566_v32, %v1623_v20  ;;  %v355_v57 = vmul.f32 %v1542_v16, %v1626_v21  ;;  %v413_v59 = vadd.f32 %v1444_v19, %v404_v41  ;;  %425 = vst [vmem:[%s1613_s10] sm:$0xff] %v1020_v45  ;;  %v397_v63 = vld [vmem:[#allocation2 + $0x4f] sm:$0xff]  ;;  %v398_v36 = vld [vmem:[#allocation2 + $0x57] sm:$0xff] }
  0x98   : > { %v1022_v58 = vpop.eup %1021  ;;  %v414_v13 = vadd.f32 %v1444_v19, %v405_v46  ;;  %541 = vst [vmem:[#allocation2 + $0x38] sm:$0xff] %v533_v42  ;;  %v356_v12 = vmul.f32 %v1579_v37, %v1626_v21  ;;  %v463_v11 = vmul.f32 %v1629_v22, %v1526_v62  ;;  %v327_v14 = vadd.f32 %v319_v50, %v299_v40 }
  0x99   : > { %542 = vst [vmem:[#allocation2 + $0x40] sm:$0xff] %v534_v47  ;;  %v590_v20 = vadd.f32 %v1674_v55, %v534_v47  ;;  %v328_v51 = vadd.f32 %v320_v56, %v300_v43  ;;  %v491_v30 = vmul.f32 %v1539_v15, %v1632_v24  ;;  %909 = vst [vmem:[%s1613_s10 + $0x21] sm:$0x80] %v1022_v58  ;;  %1029 = vtanh.f32 %v413_v59 }
  0x9a   : > { %v527_v21 = vmul.f32 %v1542_v16, %v1650_v49  ;;  %v464_v17 = vmul.f32 %v1629_v22, %v1563_v31  ;;  %v492_v18 = vmul.f32 %v1566_v32, %v1632_v24  ;;  %1031 = vtanh.f32 %v414_v13 }
  0x9b   : > { %v363_v25 = vadd.f32 %v355_v57, %v327_v14  ;;  %v364_v7 = vadd.f32 %v356_v12, %v328_v51  ;;  %v499_v35 = vadd.f32 %v491_v30, %v463_v11  ;;  %1033 = vtanh.f32 %v590_v20 }
  0x9c   : > { %v500_v40 = vadd.f32 %v492_v18, %v464_v17  ;;  %v528_v22 = vmul.f32 %v1579_v37, %v1650_v49  ;;  %v1769_v41 = vstv %s1725_s8  ;;  %v1780_v49 = vstv %s1733_s28 }
  0x9d   : > { %v1024_v24 = vpop.eup %1023  ;;  %v406_v46 = vadd.f32 %v397_v63, %v363_v25  ;;  %v407_v42 = vadd.f32 %v398_v36, %v364_v7  ;;  %v535_v43 = vadd.f32 %v527_v21, %v499_v35  ;;  %v447_v45 = vmul.f32 %v1769_v41, %v1400_v1  ;;  %v545_v25 = vld [vmem:[#allocation2 + $0x7] sm:$0xff] }
  0x9e   : > { %v1775_v47 = vpop.eup %1025  ;;  %v536_v50 = vadd.f32 %v528_v22, %v500_v40  ;;  %v448_v56 = vmul.f32 %v1769_v41, %v1406_v3  ;;  %v1783_v57 = vstv %s1735_s11  ;;  %427 = vst [vmem:[%s1613_s10 + $0x48] sm:$0xff] %v1024_v24  ;;  %v467_v12 = vmul.f32 %v1403_v2, %v1780_v49 }
  0x9f   : > { %2016 = vst [vmem:[#allocation18_spill] sm:$0xff] %v1775_v47  ;;  %v1028_v58 = vpop.eup %1027  ;;  %v415_v59 = vadd.f32 %v1444_v19, %v406_v46  ;;  %v416_v13 = vadd.f32 %v1444_v19, %v407_v42  ;;  %543 = vst [vmem:[#allocation2 + $0x50] sm:$0xff] %v535_v43  ;;  %v468_v11 = vmul.f32 %v1412_v5, %v1780_v49  ;;  %v1798_v30 = vstv %s1749_s12 }
  0xa0   : > { %544 = vst [vmem:[#allocation2 + $0x58] sm:$0xff] %v536_v50  ;;  %v591_v20 = vadd.f32 %v1674_v55, %v536_v50  ;;  %v503_v14 = vmul.f32 %v1409_v4, %v1783_v57  ;;  %v504_v51 = vmul.f32 %v1415_v6, %v1783_v57  ;;  %910 = vst [vmem:[%s1613_s10 + $0x69] sm:$0x80] %v1028_v58  ;;  %v1804_v7 = vstv %s1762_s20 }
  0xa1   : > { %1035 = vtanh.f32 %v415_v59  ;;  %v475_v21 = vadd.f32 %v467_v12, %v447_v45  ;;  %v476_v17 = vadd.f32 %v468_v11, %v448_v56  ;;  %v612_v18 = vmul.f32 %v1798_v30, %v1400_v1 }
  0xa2   : > { %1037 = vtanh.f32 %v416_v13  ;;  %v1807_v35 = vstv %s1764_s13  ;;  %v613_v63 = vmul.f32 %v1798_v30, %v1406_v3  ;;  %v1813_v36 = vadd.f32 %v1665_v0, %v1663_v60  ;;  %v546_v13 = vld [vmem:[#allocation2 + $0xf] sm:$0xff] }
  0xa3   : > { %1039 = vtanh.f32 %v591_v20  ;;  %v511_v40 = vadd.f32 %v503_v14, %v475_v21  ;;  %v640_v22 = vmul.f32 %v1403_v2, %v1804_v7  ;;  %v1030_v24 = vpop.eup %1029  ;;  %v1817_v46 = vadd.f32 %v504_v51, %v476_v17 }
  0xa4   : > { %v676_v42 = vmul.f32 %v1409_v4, %v1807_v35  ;;  %v641_v43 = vmul.f32 %v1412_v5, %v1804_v7  ;;  %v677_v45 = vmul.f32 %v1415_v6, %v1807_v35  ;;  %v1825_v50 = vpop.eup %1031  ;;  %v1830_v56 = vstv %s1773_s21  ;;  %429 = vst [vmem:[%s1613_s10 + $0x90] sm:$0xff] %v1030_v24  ;;  %v547_v24 = vld [vmem:[#allocation2 + $0x1f] sm:$0xff] }
  0xa5   : > { %2017 = vst [vmem:[#allocation19_spill] sm:$0xff] %v1825_v50  ;;  %v1827_v60 = vadd.f32 %v545_v25, %v511_v40  ;;  %v648_v0 = vadd.f32 %v640_v22, %v612_v18  ;;  %v449_v58 = vmul.f32 %v1769_v41, %v1420_v8  ;;  %v1034_v59 = vpop.eup %1033  ;;  %v450_v11 = vmul.f32 %v1769_v41, %v1453_v23 }
  0xa6   : > { %v649_v12 = vadd.f32 %v641_v43, %v613_v63  ;;  %v469_v20 = vmul.f32 %v1423_v9, %v1780_v49  ;;  %v470_v14 = vmul.f32 %v1460_v28, %v1780_v49  ;;  %v505_v21 = vmul.f32 %v1426_v10, %v1783_v57  ;;  %911 = vst [vmem:[%s1613_s10 + $0xb1] sm:$0x80] %v1034_v59  ;;  %v548_v43 = vld [vmem:[#allocation2 + $0x27] sm:$0xff] }
  0xa7   : > { %v684_v51 = vadd.f32 %v676_v42, %v648_v0  ;;  %v506_v17 = vmul.f32 %v1463_v29, %v1783_v57  ;;  %v614_v18 = vmul.f32 %v1798_v30, %v1420_v8  ;;  %v642_v22 = vmul.f32 %v1423_v9, %v1804_v7 }
  0xa8   : > { %v685_v25 = vadd.f32 %v677_v45, %v649_v12  ;;  %v477_v63 = vadd.f32 %v469_v20, %v449_v58  ;;  %v478_v40 = vadd.f32 %v470_v14, %v450_v11  ;;  %v678_v42 = vmul.f32 %v1426_v10, %v1807_v35 }
  0xa9   : > { %692 = vst [vmem:[#allocation2 + $0x8] sm:$0xff] %v684_v51  ;;  %v451_v0 = vmul.f32 %v1769_v41, %v1480_v38  ;;  %v452_v50 = vmul.f32 %v1769_v41, %v1505_v52  ;;  %v471_v8 = vmul.f32 %v1483_v39, %v1780_v49  ;;  %v650_v59 = vadd.f32 %v642_v22, %v614_v18 }
  0xaa   : > { %693 = vst [vmem:[#allocation2 + $0x10] sm:$0xff] %v685_v25  ;;  %v743_v45 = vadd.f32 %v1830_v56, %v685_v25  ;;  %v513_v9 = vadd.f32 %v505_v21, %v477_v63  ;;  %v514_v58 = vadd.f32 %v506_v17, %v478_v40  ;;  %v472_v10 = vmul.f32 %v1508_v53, %v1780_v49  ;;  %v549_v17 = vld [vmem:[#allocation2 + $0x37] sm:$0xff] }
  0xab   : > { %v1036_v12 = vpop.eup %1035  ;;  %v479_v11 = vadd.f32 %v471_v8, %v451_v0  ;;  %v507_v20 = vmul.f32 %v1490_v44, %v1783_v57  ;;  %v508_v14 = vmul.f32 %v1511_v54, %v1783_v57  ;;  %v686_v21 = vadd.f32 %v678_v42, %v650_v59 }
  0xac   : > { %v1865_v51 = vpop.eup %1037  ;;  %1041 = vtanh.f32 %v743_v45  ;;  %v556_v47 = vadd.f32 %v547_v24, %v513_v9  ;;  %v557_v25 = vadd.f32 %v548_v43, %v514_v58  ;;  %431 = vst [vmem:[%s1613_s10 + $0xd8] sm:$0xff] %v1036_v12  ;;  %v480_v63 = vadd.f32 %v472_v10, %v452_v50  ;;  %v550_v9 = vld [vmem:[#allocation2 + $0x3f] sm:$0xff] }
  0xad   : > { %2018 = vst [vmem:[#allocation20_spill] sm:$0xff] %v1865_v51  ;;  %v1040_v18 = vpop.eup %1039  ;;  %v515_v40 = vadd.f32 %v507_v20, %v479_v11  ;;  %v616_v22 = vmul.f32 %v1798_v30, %v1480_v38  ;;  %v644_v0 = vmul.f32 %v1483_v39, %v1804_v7  ;;  %694 = vst [vmem:[#allocation2 + $0x20] sm:$0xff] %v686_v21 }
  0xae   : > { %v565_v8 = vadd.f32 %v1674_v55, %v556_v47  ;;  %v566_v51 = vadd.f32 %v1674_v55, %v557_v25  ;;  %v680_v24 = vmul.f32 %v1490_v44, %v1807_v35  ;;  %v453_v43 = vmul.f32 %v1769_v41, %v1526_v62  ;;  %912 = vst [vmem:[%s1613_s10 + $0xf9] sm:$0x80] %v1040_v18 }
  0xaf   : > { %v516_v50 = vadd.f32 %v508_v14, %v480_v63  ;;  %v558_v42 = vadd.f32 %v549_v17, %v515_v40  ;;  %v652_v45 = vadd.f32 %v644_v0, %v616_v22  ;;  %v454_v38 = vmul.f32 %v1769_v41, %v1563_v31 }
  0xb0   : > { %v555_v39 = vadd.f32 %v546_v13, %v1817_v46  ;;  %v473_v47 = vmul.f32 %v1539_v15, %v1780_v49  ;;  %v474_v58 = vmul.f32 %v1566_v32, %v1780_v49  ;;  %v509_v44 = vmul.f32 %v1542_v16, %v1783_v57  ;;  %v551_v49 = vld [vmem:[#allocation2 + $0x4f] sm:$0xff] }
  0xb1   : > { %1043 = vtanh.f32 %v565_v8  ;;  %v559_v59 = vadd.f32 %v550_v9, %v516_v50  ;;  %v567_v12 = vadd.f32 %v1674_v55, %v558_v42  ;;  %v688_v10 = vadd.f32 %v680_v24, %v652_v45 }
  0xb2   : > { %v481_v11 = vadd.f32 %v473_v47, %v453_v43  ;;  %v482_v20 = vadd.f32 %v474_v58, %v454_v38  ;;  %v510_v41 = vmul.f32 %v1579_v37, %v1783_v57  ;;  %v618_v46 = vmul.f32 %v1798_v30, %v1526_v62  ;;  %v552_v57 = vld [vmem:[#allocation2 + $0x57] sm:$0xff] }
  0xb3   : > { %1045 = vtanh.f32 %v566_v51  ;;  %v568_v13 = vadd.f32 %v1674_v55, %v559_v59  ;;  %696 = vst [vmem:[#allocation2 + $0x38] sm:$0xff] %v688_v10  ;;  %v646_v14 = vmul.f32 %v1539_v15, %v1804_v7  ;;  %v682_v25 = vmul.f32 %v1542_v16, %v1807_v35 }
  0xb4   : > { %v517_v21 = vadd.f32 %v509_v44, %v481_v11  ;;  %v518_v17 = vadd.f32 %v510_v41, %v482_v20  ;;  %v615_v18 = vmul.f32 %v1798_v30, %v1453_v23  ;;  %v643_v62 = vmul.f32 %v1460_v28, %v1804_v7  ;;  %v701_v11 = vld [vmem:[#allocation2 + $0xf] sm:$0xff] }
  0xb5   : > { %1047 = vtanh.f32 %v567_v12  ;;  %v654_v51 = vadd.f32 %v646_v14, %v618_v46  ;;  %v679_v63 = vmul.f32 %v1463_v29, %v1807_v35  ;;  %v617_v15 = vmul.f32 %v1798_v30, %v1505_v52 }
  0xb6   : > { %v1042_v40 = vpop.eup %1041  ;;  %v560_v16 = vadd.f32 %v551_v49, %v517_v21  ;;  %v561_v22 = vadd.f32 %v552_v57, %v518_v17  ;;  %v651_v0 = vadd.f32 %v643_v62, %v615_v18  ;;  %v645_v23 = vmul.f32 %v1508_v53, %v1804_v7  ;;  %v2020_v18 = vld [vmem:[#allocation15_spill] sm:$0xff] }
  0xb7   : > { %v690_v8 = vadd.f32 %v682_v25, %v654_v51  ;;  %v681_v28 = vmul.f32 %v1511_v54, %v1807_v35  ;;  %v619_v24 = vmul.f32 %v1798_v30, %v1563_v31  ;;  %v647_v29 = vmul.f32 %v1566_v32, %v1804_v7  ;;  %928 = vst [vmem:[%s1613_s10 + $0x39] sm:$0x80] %v1042_v40 }
  0xb8   : > { %1049 = vtanh.f32 %v568_v13  ;;  %v569_v52 = vadd.f32 %v1674_v55, %v560_v16  ;;  %v687_v43 = vadd.f32 %v679_v63, %v651_v0  ;;  %v653_v50 = vadd.f32 %v645_v23, %v617_v15  ;;  %v2021_v63 = vld [vmem:[#allocation16_spill] sm:$0xff] }
  0xb9   : > { %v570_v42 = vadd.f32 %v1674_v55, %v561_v22  ;;  %698 = vst [vmem:[#allocation2 + $0x50] sm:$0xff] %v690_v8  ;;  %v655_v53 = vadd.f32 %v647_v29, %v619_v24  ;;  %v683_v45 = vmul.f32 %v1579_v37, %v1807_v35  ;;  %v410_v54 = vadd.f32 %v1444_v19, %v1813_v36  ;;  %v702_v19 = vld [vmem:[#allocation2 + $0x1f] sm:$0xff] }
  0xba   : > { %1051 = vtanh.f32 %v569_v52  ;;  %695 = vst [vmem:[#allocation2 + $0x28] sm:$0xff] %v687_v43  ;;  %v744_v31 = vadd.f32 %v1830_v56, %v687_v43  ;;  %v689_v32 = vadd.f32 %v681_v28, %v653_v50  ;;  %v563_v30 = vadd.f32 %v1674_v55, %v1827_v60  ;;  %v704_v35 = vld [vmem:[#allocation2 + $0x37] sm:$0xff]  ;;  %v2023_v29 = vld [vmem:[#allocation19_spill] sm:$0xff]  ;;  %v2024_v52 = vld [vmem:[#allocation20_spill] sm:$0xff] }
  0xbb   : > { %v1924_v7 = vpop.eup %1043  ;;  %v691_v38 = vadd.f32 %v683_v45, %v655_v53  ;;  %v564_v9 = vadd.f32 %v1674_v55, %v555_v39  ;;  %v602_v47 = vmul.f32 %v1455_v26, %v1400_v1  ;;  %v622_v37 = vmul.f32 %v1403_v2, %v1457_v27  ;;  %v700_v39 = vld [vmem:[#allocation2 + $0x7] sm:$0xff]  ;;  %v2022_v28 = vld [vmem:[#allocation18_spill] sm:$0xff]  ;;  %430 = vst [vmem:[%s1613_s10 + $0x98] sm:$0xff] %v2023_v29 }
  0xbc   : > { %1053 = vtanh.f32 %v744_v31  ;;  %697 = vst [vmem:[#allocation2 + $0x40] sm:$0xff] %v689_v32  ;;  %v745_v36 = vadd.f32 %v1830_v56, %v689_v32  ;;  %v658_v60 = vmul.f32 %v1409_v4, %v1469_v33  ;;  %v603_v58 = vmul.f32 %v1455_v26, %v1406_v3  ;;  %428 = vst [vmem:[%s1613_s10 + $0x50] sm:$0xff] %v2022_v28 }
  0xbd   : > { %v1936_v44 = vpop.eup %1045  ;;  %699 = vst [vmem:[#allocation2 + $0x58] sm:$0xff] %v691_v38  ;;  %v746_v1 = vadd.f32 %v1830_v56, %v691_v38  ;;  %1055 = vtanh.f32 %v410_v54  ;;  %v630_v55 = vadd.f32 %v622_v37, %v602_v47  ;;  %v623_v2 = vmul.f32 %v1412_v5, %v1457_v27  ;;  %432 = vst [vmem:[%s1613_s10 + $0xe0] sm:$0xff] %v2024_v52 }
  0xbe   : > { %1057 = vtanh.f32 %v745_v36  ;;  %v659_v59 = vmul.f32 %v1415_v6, %v1469_v33  ;;  %v711_v4 = vadd.f32 %v702_v19, %v1498_v48  ;;  %v713_v12 = vadd.f32 %v704_v35, %v1572_v34  ;;  %v2019_v48 = vld [vmem:[#allocation17_spill] sm:$0xff]  ;;  %903 = vst [vmem:[%s1613_s10 + $0x60] sm:$0xff] %v1924_v7  ;;  %904 = vst [vmem:[%s1613_s10 + $0x68] sm:$0xff] %v1936_v44 }
  0xbf   : > { %v1048_v3 = vpop.eup %1047  ;;  %1059 = vtanh.f32 %v746_v1  ;;  %v666_v26 = vadd.f32 %v658_v60, %v630_v55  ;;  %v631_v10 = vadd.f32 %v623_v2, %v603_v58 }
  0xc0   : > { %1061 = vtanh.f32 %v563_v30  ;;  %v720_v20 = vadd.f32 %v1830_v56, %v711_v4  ;;  %v722_v41 = vadd.f32 %v1830_v56, %v713_v12  ;;  %v706_v5 = vld [vmem:[#allocation2 + $0x4f] sm:$0xff]  ;;  %905 = vst [vmem:[%s1613_s10 + $0xa8] sm:$0xff] %v1048_v3 }
  0xc1   : > { %1063 = vtanh.f32 %v564_v9  ;;  %v709_v27 = vadd.f32 %v700_v39, %v666_v26  ;;  %v667_v46 = vadd.f32 %v659_v59, %v631_v10  ;;  %v703_v13 = vld [vmem:[#allocation2 + $0x27] sm:$0xff]  ;;  %v715_v6 = vadd.f32 %v706_v5, %v1603_v61 }
  0xc2   : > { %v1050_v33 = vpop.eup %1049  ;;  %1065 = vtanh.f32 %v570_v42  ;;  %v712_v34 = vadd.f32 %v703_v13, %v2019_v48 }
  0xc3   : > { %v718_v49 = vadd.f32 %v1830_v56, %v709_v27  ;;  %v710_v14 = vadd.f32 %v701_v11, %v667_v46  ;;  %1067 = vtanh.f32 %v720_v20  ;;  %v705_v25 = vld [vmem:[#allocation2 + $0x3f] sm:$0xff]  ;;  %v724_v51 = vadd.f32 %v1830_v56, %v715_v6  ;;  %906 = vst [vmem:[%s1613_s10 + $0xb0] sm:$0xff] %v1050_v33 }
  0xc4   : > { %v1052_v21 = vpop.eup %1051  ;;  %v721_v17 = vadd.f32 %v1830_v56, %v712_v34  ;;  %1069 = vtanh.f32 %v722_v41  ;;  %v714_v62 = vadd.f32 %v705_v25, %v2020_v18  ;;  %v707_v57 = vld [vmem:[#allocation2 + $0x57] sm:$0xff] }
  0xc5   : > { %1071 = vtanh.f32 %v718_v49  ;;  %v719_v61 = vadd.f32 %v1830_v56, %v710_v14  ;;  %v716_v15 = vadd.f32 %v707_v57, %v2021_v63  ;;  %907 = vst [vmem:[%s1613_s10 + $0xf0] sm:$0xff] %v1052_v21 }
  0xc6   : > { %v1054_v40 = vpop.eup %1053  ;;  %1073 = vtanh.f32 %v721_v17  ;;  %v723_v16 = vadd.f32 %v1830_v56, %v714_v62 }
  0xc7   : > { %v1056_v22 = vpop.eup %1055  ;;  %929 = vst [vmem:[%s1613_s10 + $0x81] sm:$0x80] %v1054_v40  ;;  %1075 = vtanh.f32 %v719_v61  ;;  %v725_v0 = vadd.f32 %v1830_v56, %v716_v15 }
  0xc8   : > { %v1058_v23 = vpop.eup %1057  ;;  %426 = vst [vmem:[%s1613_s10 + $0x8] sm:$0xff] %v1056_v22  ;;  %1077 = vtanh.f32 %v723_v16 }
  0xc9   : > { %v1060_v8 = vpop.eup %1059  ;;  %930 = vst [vmem:[%s1613_s10 + $0xc9] sm:$0x80] %v1058_v23  ;;  %1079 = vtanh.f32 %v724_v51 }
  0xca   : > { %v1062_v24 = vpop.eup %1061  ;;  %931 = vst [vmem:[%s1613_s10 + $0x111] sm:$0x80] %v1060_v8  ;;  %1081 = vtanh.f32 %v725_v0 }
  0xcb   : > { %v1064_v56 = vpop.eup %1063  ;;  %901 = vst [vmem:[%s1613_s10 + $0x18] sm:$0xff] %v1062_v24 }
  0xcc   : > { %v1066_v43 = vpop.eup %1065  ;;  %902 = vst [vmem:[%s1613_s10 + $0x20] sm:$0xff] %v1064_v56 }
  0xcd   : > { %v1068_v50 = vpop.eup %1067  ;;  %908 = vst [vmem:[%s1613_s10 + $0xf8] sm:$0xff] %v1066_v43 }
  0xce   : > { %v1070_v42 = vpop.eup %1069  ;;  %922 = vst [vmem:[%s1613_s10 + $0x78] sm:$0xff] %v1068_v50 }
  0xcf   : > { %v1072_v53 = vpop.eup %1071  ;;  %924 = vst [vmem:[%s1613_s10 + $0xc0] sm:$0xff] %v1070_v42 }
  0xd0   : > { %v1074_v45 = vpop.eup %1073  ;;  %920 = vst [vmem:[%s1613_s10 + $0x30] sm:$0xff] %v1072_v53 }
  0xd1   : > { %v1076_v54 = vpop.eup %1075  ;;  %923 = vst [vmem:[%s1613_s10 + $0x80] sm:$0xff] %v1074_v45 }
  0xd2   : > { %v1078_v31 = vpop.eup %1077  ;;  %921 = vst [vmem:[%s1613_s10 + $0x38] sm:$0xff] %v1076_v54 }
  0xd3   : > { %v1080_v32 = vpop.eup %1079  ;;  %925 = vst [vmem:[%s1613_s10 + $0xc8] sm:$0xff] %v1078_v31 }
  0xd4   : > { %v1082_v30 = vpop.eup %1081  ;;  %926 = vst [vmem:[%s1613_s10 + $0x108] sm:$0xff] %v1080_v32 }
  0xd5   : > { %927 = vst [vmem:[%s1613_s10 + $0x110] sm:$0xff] %v1082_v30 }
  0xd6 PF: > { %p17_p12 = scmp.ge.s32.totalorder %s1291_s30, 4   ;;  %s2025_s15 = smov %s1194_s16 }
  0xd7   : > { %s2026_s16 = smov %s1198_s17  ;;  %s2027_s17 = smov %s1335_s5 }
  0xd8   : > { %s2028_s18 = smov %s1291_s30  ;;  %19 = sbr.rel (!%p17_p12) target bundleno = 6 (0x6), region = 94 }
  0xdf   :  { %779 = vsyncpa [#allocation4], 1 }
  0xe0   :  { %781 = vsyncpa [#allocation4 + $0x1], 1 }
  0xe1   :  { %782 = vsyncpa [#allocation5], 1 }
  0xe2   :  { %784 = vsyncpa [#allocation5 + $0x1], 1 }
  0xe3   :  { %785 = vsyncpa [#allocation6], 1 }
  0xe4   :  { %787 = vsyncpa [#allocation6 + $0x1], 1 }
  0xe5   :  { %788 = vsyncpa [#allocation9], 1 }

</bundles_post_ra>
